<compile_context>
chip_gen: v5e
topology: v5e:2x2
jax: 0.10.0
libtpu: 0.0.40
codegen_flags: <defaults>
</compile_context>

<pallas_src>
import functools

import jax
import jax.numpy as jnp
from jax.experimental import pallas as pl
from jax.experimental.pallas import tpu as pltpu

FEATURE_DIM = 4
HIDDEN_DIM = 128
NUM_ACTION = 2

_LANE = 128
_MAX_BATCH_TILE = 1024


def _round_up(n, m):
    return ((n + m - 1) // m) * m


def _policy_kernel(xt_ref, w1_ref, b1_ref, wd_ref, bd_ref, out_ref):
    # xt : (FEATURE_DIM, TB)        batch on the lane axis
    # w1 : (HIDDEN_DIM, FEATURE_DIM) torch (out, in) layout
    # b1 : (HIDDEN_DIM, 1)
    # wd : (HIDDEN_DIM, 1)          = (w2[0, :] - w2[1, :]) as a column
    # bd : (1, 1)                   = b2[0] - b2[1]
    # out: (NUM_ACTION, TB)
    xt = xt_ref[...]
    w1 = w1_ref[...]

    # ---- Linear 1: h^T = W1 @ x^T + b1, as FEATURE_DIM broadcast multiply-adds (VPU).
    h = b1_ref[...] + w1[:, 0:1] * xt[0:1, :]
    for k in range(1, FEATURE_DIM):
        h = h + w1[:, k:k + 1] * xt[k:k + 1, :]

    # ---- Dropout(p=0.6): eval-mode identity (see TODO above).
    # ---- ReLU (VPU).
    h = jnp.maximum(h, 0.0)

    # ---- Linear 2 collapsed to the logit difference d = l0 - l1 (sublane reduce).
    d = jnp.sum(h * wd_ref[...], axis=0, keepdims=True) + bd_ref[...]   # (1, TB)

    # ---- 2-way softmax, stable shifted form:  m = max(d, 0)
    #      p0 = exp(d - m) / (exp(d - m) + exp(-m)),  p1 = exp(-m) / (...)
    m = jnp.maximum(d, 0.0)
    e0 = jnp.exp(d - m)
    e1 = jnp.exp(-m)
    denom = e0 + e1
    inv = pl.reciprocal(denom, approx=True)      # EUP vrcp (free VLIW slot)
    inv = inv * (2.0 - denom * inv)              # one Newton step -> ~f32 exact
    p0 = e0 * inv
    p1 = e1 * inv

    row = jax.lax.broadcasted_iota(jnp.int32, out_ref.shape, 0)
    out_ref[...] = jnp.where(row == 0, p0, p1)


@functools.partial(jax.jit, static_argnames=("block_b",))
def softmax_policy_forward(x, w1, b1, w2, b2, *, block_b=None):
    """x: (B, FEATURE_DIM) f32 -> (B, NUM_ACTION) action probabilities.

    Weights are in PyTorch layout: w1 (128, 4), b1 (128,), w2 (2, 128), b2 (2,).
    """
    B = x.shape[0]
    if block_b is None:
        block_b = min(_MAX_BATCH_TILE, _round_up(B, _LANE))
    tb = _round_up(block_b, _LANE)
    b_pad = _round_up(B, tb)
    num_tiles = b_pad // tb

    # Transpose so the batch is lane-dense; pad batch to a multiple of the tile.
    xt = jnp.pad(x.astype(jnp.float32), ((0, b_pad - B), (0, 0))).T      # (4, B_pad)
    b1_col = b1.reshape(HIDDEN_DIM, 1).astype(jnp.float32)
    w_diff = (w2[0, :] - w2[1, :]).reshape(HIDDEN_DIM, 1).astype(jnp.float32)
    b_diff = (b2[0] - b2[1]).reshape(1, 1).astype(jnp.float32)

    out_t = pl.pallas_call(
        _policy_kernel,
        out_shape=jax.ShapeDtypeStruct((NUM_ACTION, b_pad), jnp.float32),
        grid=(num_tiles,),
        in_specs=[
            pl.BlockSpec((FEATURE_DIM, tb), lambda i: (0, i)),            # x^T tile
            pl.BlockSpec((HIDDEN_DIM, FEATURE_DIM), lambda i: (0, 0)),    # w1 (invariant)
            pl.BlockSpec((HIDDEN_DIM, 1), lambda i: (0, 0)),              # b1
            pl.BlockSpec((HIDDEN_DIM, 1), lambda i: (0, 0)),              # w_diff
            pl.BlockSpec((1, 1), lambda i: (0, 0)),                       # b_diff
        ],
        out_specs=pl.BlockSpec((NUM_ACTION, tb), lambda i: (0, i)),
        compiler_params=pltpu.CompilerParams(
            dimension_semantics=("parallel",),
        ),
    )(xt, w1.astype(jnp.float32), b1_col, w_diff, b_diff)

    return out_t[:, :B].T


def init_params(key):
    """Deterministic PyTorch-style uniform(-1/sqrt(fan_in), 1/sqrt(fan_in)) init."""
    k1, k2, k3, k4 = jax.random.split(key, 4)
    bound1 = 1.0 / jnp.sqrt(jnp.float32(FEATURE_DIM))
    bound2 = 1.0 / jnp.sqrt(jnp.float32(HIDDEN_DIM))
    # torch layout: (out_features, in_features)
    w1 = jax.random.uniform(k1, (HIDDEN_DIM, FEATURE_DIM), jnp.float32, -bound1, bound1)
    b1 = jax.random.uniform(k2, (HIDDEN_DIM,), jnp.float32, -bound1, bound1)
    w2 = jax.random.uniform(k3, (NUM_ACTION, HIDDEN_DIM), jnp.float32, -bound2, bound2)
    b2 = jax.random.uniform(k4, (NUM_ACTION,), jnp.float32, -bound2, bound2)
    return w1, b1, w2, b2


def reference_forward(x, w1, b1, w2, b2):
    hp = jax.lax.Precision.HIGHEST
    h = jnp.maximum(jnp.dot(x, w1.T, precision=hp) + b1, 0.0)
    logits = jnp.dot(h, w2.T, precision=hp) + b2
    return jax.nn.softmax(logits, axis=1)


if __name__ == "__main__":
    key = jax.random.PRNGKey(0)
    kx, kp = jax.random.split(key)
    w1, b1, w2, b2 = init_params(kp)

    # Case 1: tiny batch (select_action-style path).
    B = 2
    x = jax.random.normal(kx, (B, FEATURE_DIM), jnp.float32)
    probs = jax.block_until_ready(softmax_policy_forward(x, w1, b1, w2, b2))
    ref = reference_forward(x, w1, b1, w2, b2)
    assert probs.shape == (B, NUM_ACTION)
    assert jnp.allclose(jnp.sum(probs, axis=1), 1.0, atol=1e-5)
    assert jnp.allclose(probs, ref, atol=2e-5, rtol=2e-5)

    # Case 2: batch not divisible by the tile -> padding + multi-step parallel grid.
    B2 = 300
    x2 = jax.random.normal(jax.random.fold_in(kx, 1), (B2, FEATURE_DIM), jnp.float32)
    probs2 = jax.block_until_ready(
        softmax_policy_forward(x2, w1, b1, w2, b2, block_b=128))
    ref2 = reference_forward(x2, w1, b1, w2, b2)
    assert probs2.shape == (B2, NUM_ACTION)
    assert jnp.allclose(jnp.sum(probs2, axis=1), 1.0, atol=1e-5)
    assert jnp.allclose(probs2, ref2, atol=2e-5, rtol=2e-5)

    print("KERNEL_OK")
</pallas_src>

<mosaic_0001>
module attributes {stable_mosaic.version = 11 : i64} {
  func.func @_policy_kernel(%arg0: i32, %arg1: memref<4x128xf32, #tpu.memory_space<vmem>>, %arg2: memref<128x4xf32, #tpu.memory_space<vmem>>, %arg3: memref<128x1xf32, #tpu.memory_space<vmem>>, %arg4: memref<128x1xf32, #tpu.memory_space<vmem>>, %arg5: memref<1x1xf32, #tpu.memory_space<vmem>>, %arg6: memref<2x128xf32, #tpu.memory_space<vmem>>) attributes {dimension_semantics = [#tpu.dimension_semantics<parallel>], iteration_bounds = array<i64: 1>, scalar_prefetch = 0 : i64, scratch_operands = 0 : i64, tpu.core_type = #tpu.core_type<tc>, window_params = [{transform_indices = @transform_0, window_bounds = array<i64: 4, 128>}, {pipeline_mode = #tpu.pipeline_mode<synchronous>, transform_indices = @transform_1, window_bounds = array<i64: 128, 4>}, {pipeline_mode = #tpu.pipeline_mode<synchronous>, transform_indices = @transform_2, window_bounds = array<i64: 128, 1>}, {pipeline_mode = #tpu.pipeline_mode<synchronous>, transform_indices = @transform_3, window_bounds = array<i64: 128, 1>}, {pipeline_mode = #tpu.pipeline_mode<synchronous>, transform_indices = @transform_4, window_bounds = array<i64: 1, 1>}, {transform_indices = @transform_5, window_bounds = array<i64: 2, 128>}]} {
    %c0 = arith.constant 0 : index
    %c0_0 = arith.constant 0 : index
    %0 = vector.load %arg1[%c0, %c0_0] : memref<4x128xf32, #tpu.memory_space<vmem>>, vector<4x128xf32>
    %c0_1 = arith.constant 0 : index
    %c0_2 = arith.constant 0 : index
    %1 = vector.load %arg2[%c0_1, %c0_2] : memref<128x4xf32, #tpu.memory_space<vmem>>, vector<128x4xf32>
    %c0_3 = arith.constant 0 : index
    %c0_4 = arith.constant 0 : index
    %2 = vector.load %arg3[%c0_3, %c0_4] : memref<128x1xf32, #tpu.memory_space<vmem>>, vector<128x1xf32>
    %3 = vector.extract_strided_slice %1 {offsets = [0, 0], sizes = [128, 1], strides = [1, 1]} : vector<128x4xf32> to vector<128x1xf32>
    %4 = vector.extract_strided_slice %0 {offsets = [0, 0], sizes = [1, 128], strides = [1, 1]} : vector<4x128xf32> to vector<1x128xf32>
    %5 = vector.broadcast %3 : vector<128x1xf32> to vector<128x128xf32>
    %6 = vector.broadcast %4 : vector<1x128xf32> to vector<128x128xf32>
    %7 = arith.mulf %5, %6 : vector<128x128xf32>
    %8 = vector.broadcast %2 : vector<128x1xf32> to vector<128x128xf32>
    %9 = arith.addf %8, %7 : vector<128x128xf32>
    %10 = vector.extract_strided_slice %1 {offsets = [0, 1], sizes = [128, 1], strides = [1, 1]} : vector<128x4xf32> to vector<128x1xf32>
    %11 = vector.extract_strided_slice %0 {offsets = [1, 0], sizes = [1, 128], strides = [1, 1]} : vector<4x128xf32> to vector<1x128xf32>
    %12 = vector.broadcast %10 : vector<128x1xf32> to vector<128x128xf32>
    %13 = vector.broadcast %11 : vector<1x128xf32> to vector<128x128xf32>
    %14 = arith.mulf %12, %13 : vector<128x128xf32>
    %15 = arith.addf %9, %14 : vector<128x128xf32>
    %16 = vector.extract_strided_slice %1 {offsets = [0, 2], sizes = [128, 1], strides = [1, 1]} : vector<128x4xf32> to vector<128x1xf32>
    %17 = vector.extract_strided_slice %0 {offsets = [2, 0], sizes = [1, 128], strides = [1, 1]} : vector<4x128xf32> to vector<1x128xf32>
    %18 = vector.broadcast %16 : vector<128x1xf32> to vector<128x128xf32>
    %19 = vector.broadcast %17 : vector<1x128xf32> to vector<128x128xf32>
    %20 = arith.mulf %18, %19 : vector<128x128xf32>
    %21 = arith.addf %15, %20 : vector<128x128xf32>
    %22 = vector.extract_strided_slice %1 {offsets = [0, 3], sizes = [128, 1], strides = [1, 1]} : vector<128x4xf32> to vector<128x1xf32>
    %23 = vector.extract_strided_slice %0 {offsets = [3, 0], sizes = [1, 128], strides = [1, 1]} : vector<4x128xf32> to vector<1x128xf32>
    %24 = vector.broadcast %22 : vector<128x1xf32> to vector<128x128xf32>
    %25 = vector.broadcast %23 : vector<1x128xf32> to vector<128x128xf32>
    %26 = arith.mulf %24, %25 : vector<128x128xf32>
    %27 = arith.addf %21, %26 : vector<128x128xf32>
    %cst = arith.constant 0.000000e+00 : f32
    %28 = vector.broadcast %cst : f32 to vector<128x128xf32>
    %29 = arith.maximumf %27, %28 : vector<128x128xf32>
    %c0_5 = arith.constant 0 : index
    %c0_6 = arith.constant 0 : index
    %30 = vector.load %arg4[%c0_5, %c0_6] : memref<128x1xf32, #tpu.memory_space<vmem>>, vector<128x1xf32>
    %31 = vector.broadcast %30 : vector<128x1xf32> to vector<128x128xf32>
    %32 = arith.mulf %29, %31 : vector<128x128xf32>
    %cst_7 = arith.constant dense<0.000000e+00> : vector<128xf32>
    %33 = vector.multi_reduction <add>, %32, %cst_7 [0] : vector<128x128xf32> to vector<128xf32>
    %34 = vector.shape_cast %33 : vector<128xf32> to vector<1x128xf32>
    %c0_8 = arith.constant 0 : index
    %c0_9 = arith.constant 0 : index
    %35 = vector.load %arg5[%c0_8, %c0_9] : memref<1x1xf32, #tpu.memory_space<vmem>>, vector<1x1xf32>
    %36 = vector.broadcast %35 : vector<1x1xf32> to vector<1x128xf32>
    %37 = arith.addf %34, %36 : vector<1x128xf32>
    %cst_10 = arith.constant 0.000000e+00 : f32
    %38 = vector.broadcast %cst_10 : f32 to vector<1x128xf32>
    %39 = arith.maximumf %37, %38 : vector<1x128xf32>
    %40 = arith.subf %37, %39 : vector<1x128xf32>
    %41 = math.exp %40 : vector<1x128xf32>
    %cst_11 = arith.constant 0.000000e+00 : f32
    %42 = vector.broadcast %cst_11 : f32 to vector<1x128xf32>
    %43 = arith.subf %42, %39 : vector<1x128xf32>
    %44 = math.exp %43 : vector<1x128xf32>
    %45 = arith.addf %41, %44 : vector<1x128xf32>
    %46 = tpu.reciprocal %45 {approx = true} : vector<1x128xf32> -> vector<1x128xf32>
    %47 = arith.mulf %45, %46 : vector<1x128xf32>
    %cst_12 = arith.constant 2.000000e+00 : f32
    %48 = vector.broadcast %cst_12 : f32 to vector<1x128xf32>
    %49 = arith.subf %48, %47 : vector<1x128xf32>
    %50 = arith.mulf %46, %49 : vector<1x128xf32>
    %51 = arith.mulf %41, %50 : vector<1x128xf32>
    %52 = arith.mulf %44, %50 : vector<1x128xf32>
    %53 = tpu.iota {dimensions = array<i32: 0>} : vector<2x128xi32>
    %c0_i32 = arith.constant 0 : i32
    %54 = vector.broadcast %c0_i32 : i32 to vector<2x128xi32>
    %55 = arith.cmpi eq, %53, %54 : vector<2x128xi32>
    %56 = vector.shape_cast %51 : vector<1x128xf32> to vector<1x128xf32>
    %57 = vector.broadcast %56 : vector<1x128xf32> to vector<2x128xf32>
    %58 = vector.shape_cast %52 : vector<1x128xf32> to vector<1x128xf32>
    %59 = vector.broadcast %58 : vector<1x128xf32> to vector<2x128xf32>
    %60 = arith.select %55, %57, %59 : vector<2x128xi1>, vector<2x128xf32>
    %c0_13 = arith.constant 0 : index
    %c0_14 = arith.constant 0 : index
    %61 = vector.load %arg6[%c0_13, %c0_14] : memref<2x128xf32, #tpu.memory_space<vmem>>, vector<2x128xf32>
    tpu.vector_store %arg6[%c0_13, %c0_14], %60 {strides = array<i32>} : memref<2x128xf32, #tpu.memory_space<vmem>>, vector<2x128xf32>,
    return
  }
  func.func @transform_0(%arg0: i32) -> (i32, i32) {
    %c0_i32 = arith.constant 0 : i32
    %c0_i32_0 = arith.constant 0 : i32
    return %c0_i32, %arg0 : i32, i32
  }
  func.func @transform_1(%arg0: i32) -> (i32, i32) {
    %c0_i32 = arith.constant 0 : i32
    %c0_i32_0 = arith.constant 0 : i32
    %c0_i32_1 = arith.constant 0 : i32
    return %c0_i32, %c0_i32_0 : i32, i32
  }
  func.func @transform_2(%arg0: i32) -> (i32, i32) {
    %c0_i32 = arith.constant 0 : i32
    %c0_i32_0 = arith.constant 0 : i32
    %c0_i32_1 = arith.constant 0 : i32
    return %c0_i32, %c0_i32_0 : i32, i32
  }
  func.func @transform_3(%arg0: i32) -> (i32, i32) {
    %c0_i32 = arith.constant 0 : i32
    %c0_i32_0 = arith.constant 0 : i32
    %c0_i32_1 = arith.constant 0 : i32
    return %c0_i32, %c0_i32_0 : i32, i32
  }
  func.func @transform_4(%arg0: i32) -> (i32, i32) {
    %c0_i32 = arith.constant 0 : i32
    %c0_i32_0 = arith.constant 0 : i32
    %c0_i32_1 = arith.constant 0 : i32
    return %c0_i32, %c0_i32_0 : i32, i32
  }
  func.func @transform_5(%arg0: i32) -> (i32, i32) {
    %c0_i32 = arith.constant 0 : i32
    %c0_i32_0 = arith.constant 0 : i32
    return %c0_i32, %arg0 : i32, i32
  }
}

</mosaic_0001>

<bundles_post_ra>
// kernel: softmax_policy_forward.1
= control target key start
LH: loop header
LB: loop body
LE: loop exit
PB: predicated region body
PF: predicated region fallthrough
CT: control target
= control target key end

     0   :  { %v746_v0 = vmov 1   ;;  %v747_v1 = vmov 0   ;;  %v748_v19 = vmov 2   ;;  %s1262_s1 = inlined_call_operand.vmem [shape: f32[128,4], index: 1, kind: input, shape index: {}]   ;;  %s1263_s2 = inlined_call_operand.vmem [shape: f32[128,1], index: 2, kind: input, shape index: {}]   ;;  %s1264_s0 = inlined_call_operand.vmem [shape: f32[4,128], index: 0, kind: input, shape index: {}]   ;;  %s1265_s3 = inlined_call_operand.vmem [shape: f32[128,1], index: 3, kind: input, shape index: {}]   ;;  %s1266_s4 = inlined_call_operand.<no memory space> [shape: f32[1,1], index: 4, kind: input, shape index: {}]   ;;  %s1267_s5 = inlined_call_operand.vmem [shape: f32[2,128], index: 5, kind: output, shape index: {}]  }
   0x1   :  { %726 = vset.pattern.permute.xlu0 %v746_v0  ;;  %724 = vset.pattern.permute.xlu2 %v747_v1  ;;  %v785_v2 = vld [vmem:[%s1262_s1 + $0x20] sm:$0xff]  ;;  %v790_v3 = vld [vmem:[%s1262_s1 + $0x10] sm:$0xff]  ;;  %v795_v4 = vld [vmem:[%s1262_s1 + $0x8] sm:$0xff] }
   0x2   :  { %723 = vset.pattern.permute.xlu1 %v747_v1  ;;  %77 = vperm.xlu2 %724, %v785_v2   ;;  %v804_v5 = vld [vmem:[%s1262_s1 + $0x28] sm:$0xff]  ;;  %v809_v6 = vld [vmem:[%s1262_s1 + $0x18] sm:$0xff]  ;;  %v814_v7 = vld [vmem:[%s1262_s1 + $0x30] sm:$0xff] }
   0x3   :  { %67 = vperm.xlu1 %723, %v790_v3   ;;  %253 = vperm.xlu0 %726, %v795_v4   ;;  %v822_v8 = vld [vmem:[%s1262_s1 + $0x40] sm:$0xff]  ;;  %v827_v9 = vld [vmem:[%s1262_s1 + $0x38] sm:$0xff]  ;;  %v832_v10 = vld [vmem:[%s1262_s1 + $0x48] sm:$0xff] }
   0x4   :  { %v840_v11 = vld [vmem:[%s1262_s1 + $0x58] sm:$0xff]  ;;  %v845_v12 = vld [vmem:[%s1262_s1 + $0x50] sm:$0xff]  ;;  %v850_v13 = vld [vmem:[%s1262_s1 + $0x60] sm:$0xff] }
   0x5   :  { %v858_v14 = vld [vmem:[%s1262_s1 + $0x70] sm:$0xff]  ;;  %v863_v15 = vld [vmem:[%s1262_s1 + $0x68] sm:$0xff]  ;;  %v868_v16 = vld [vmem:[%s1262_s1 + $0x78] sm:$0xff] }
   0x6   :  { %v40_v17 = vld [vmem:[%s1263_s2 + $0x8] sm:$0xff]  ;;  %v39_v18 = vld [vmem:[%s1263_s2] sm:$0xff]  ;;  %v42_v21 = vld [vmem:[%s1263_s2 + $0x18] sm:$0xff] }
   0x7   :  { %v43_v20 = vld [vmem:[%s1263_s2 + $0x20] sm:$0xff]  ;;  %v46_v22 = vld [vmem:[%s1263_s2 + $0x38] sm:$0xff]  ;;  %v45_v23 = vld [vmem:[%s1263_s2 + $0x30] sm:$0xff] }
   0x8   :  { %v49_v24 = vld [vmem:[%s1263_s2 + $0x50] sm:$0xff]  ;;  %v48_v25 = vld [vmem:[%s1263_s2 + $0x48] sm:$0xff]  ;;  %v51_v27 = vld [vmem:[%s1263_s2 + $0x60] sm:$0xff] }
   0x9   :  { %v52_v26 = vld [vmem:[%s1263_s2 + $0x68] sm:$0xff]  ;;  %v910_v28 = vld [vmem:[%s1262_s1] sm:$0xff]  ;;  %v54_v29 = vld [vmem:[%s1263_s2 + $0x78] sm:$0xff] }
   0xa   :  { %82 = vperm.xlu2 %724, %v804_v5   ;;  %v41_v36 = vld [vmem:[%s1263_s2 + $0x10] sm:$0xff]  ;;  %v44_v40 = vld [vmem:[%s1263_s2 + $0x28] sm:$0xff]  ;;  %v964_v44 = vld [vmem:[%s1264_s0] sm:$0xf] }
   0xb   :  { %72 = vperm.xlu1 %723, %v809_v6   ;;  %273 = vperm.xlu0 %726, %v814_v7   ;;  %v967_v45 = vperm.slane %v964_v44, 0  ;;  %v47_v46 = vld [vmem:[%s1263_s2 + $0x40] sm:$0xff]  ;;  %v50_v52 = vld [vmem:[%s1263_s2 + $0x58] sm:$0xff]  ;;  %v53_v58 = vld [vmem:[%s1263_s2 + $0x70] sm:$0xff] }
  0x12   :  { %97 = vperm.xlu2 %724, %v822_v8  }
  0x13   :  { %92 = vperm.xlu1 %723, %v827_v9   ;;  %285 = vperm.xlu0 %726, %v832_v10  }
  0x1a   :  { %112 = vperm.xlu2 %724, %v840_v11  }
  0x1b   :  { %107 = vperm.xlu1 %723, %v845_v12   ;;  %297 = vperm.xlu0 %726, %v850_v13  }
  0x22   :  { %127 = vperm.xlu2 %724, %v858_v14  }
  0x23   :  { %122 = vperm.xlu1 %723, %v863_v15   ;;  %309 = vperm.xlu0 %726, %v868_v16  }
  0x2a   :  { %159 = vperm.xlu2 %724, %v40_v17  }
  0x2b   :  { %154 = vperm.xlu1 %723, %v39_v18   ;;  %730 = vset.pattern.permute.xlu0 %v748_v19 }
  0x2c   :  { %354 = vperm.xlu0 %730, %v790_v3  }
  0x32   :  { %174 = vperm.xlu2 %724, %v43_v20  }
  0x33   :  { %169 = vperm.xlu1 %723, %v42_v21  }
  0x34   :  { %374 = vperm.xlu0 %730, %v827_v9  }
  0x3a   :  { %189 = vperm.xlu2 %724, %v46_v22  }
  0x3b   :  { %184 = vperm.xlu1 %723, %v45_v23  }
  0x3c   :  { %386 = vperm.xlu0 %730, %v845_v12  }
  0x42   :  { %204 = vperm.xlu2 %724, %v49_v24   ;;  %v560_v24 = vld [vmem:[%s1265_s3 + $0x28] sm:$0xff] }
  0x43   :  { %199 = vperm.xlu1 %723, %v48_v25  }
  0x44   :  { %398 = vperm.xlu0 %730, %v863_v15  }
  0x4a   :  { %219 = vperm.xlu2 %724, %v52_v26  }
  0x4b   :  { %214 = vperm.xlu1 %723, %v51_v27  }
  0x4c   :  { %731 = vset.pattern.permute.xlu0 %v747_v1 }
  0x4d   :  { %57 = vperm.xlu0 %731, %v910_v28  }
  0x52   :  { %725 = vset.pattern.permute.xlu2 %v746_v0 }
  0x53   :  { %229 = vperm.xlu1 %723, %v54_v29   ;;  %249 = vperm.xlu2 %725, %v910_v28   ;;  %v563_v29 = vld [vmem:[%s1265_s3 + $0x40] sm:$0xff] }
  0x55   :  { %62 = vperm.xlu0 %731, %v795_v4  }
  0x5b   :  { %727 = vset.pattern.permute.xlu1 %v746_v0  ;;  %261 = vperm.xlu2 %725, %v809_v6   ;;  %v555_v0 = vld [vmem:[%s1265_s3] sm:$0xff] }
  0x5c   :  { %257 = vperm.xlu1 %727, %v790_v3   ;;  %v78_v30 = vpop.permute.xlu2 %77 }
  0x5d   :  { %87 = vperm.xlu0 %731, %v814_v7   ;;  %v140_v47 = vmul.f32 %v967_v45, %v78_v30  ;;  %v1021_v30 = vperm.slane %v964_v44, 1 }
  0x63   :  { %269 = vperm.xlu2 %725, %v804_v5  }
  0x64   :  { %265 = vperm.xlu1 %727, %v785_v2   ;;  %v926_v31 = vpop.permute.xlu2 %82 }
  0x65   :  { %102 = vperm.xlu0 %731, %v832_v10  }
  0x6b   :  { %281 = vperm.xlu2 %725, %v822_v8  }
  0x6c   :  { %277 = vperm.xlu1 %727, %v827_v9   ;;  %v931_v32 = vpop.permute.xlu2 %97 }
  0x6d   :  { %117 = vperm.xlu0 %731, %v850_v13  }
  0x73   :  { %293 = vperm.xlu2 %725, %v840_v11  }
  0x74   :  { %289 = vperm.xlu1 %727, %v845_v12   ;;  %v936_v33 = vpop.permute.xlu2 %112 }
  0x75   :  { %v938_v34 = vpop.permute.xlu1 %67  ;;  %132 = vperm.xlu0 %731, %v868_v16   ;;  %v941_v35 = vpop.permute.xlu0 %253 }
  0x7b   :  { %305 = vperm.xlu2 %725, %v858_v14  }
  0x7c   :  { %301 = vperm.xlu1 %727, %v863_v15   ;;  %v948_v37 = vpop.permute.xlu2 %127 }
  0x7d   :  { %v73_v38 = vpop.permute.xlu1 %72  ;;  %164 = vperm.xlu0 %731, %v41_v36   ;;  %v950_v39 = vpop.permute.xlu0 %273  ;;  %v749_v36 = vmov 3  }
  0x7e   :  { %v139_v18 = vmul.f32 %v967_v45, %v73_v38 }
  0x83   :  { %729 = vset.pattern.permute.xlu2 %v748_v19 }
  0x84   :  { %728 = vset.pattern.permute.xlu1 %v748_v19  ;;  %v955_v41 = vpop.permute.xlu2 %159  ;;  %350 = vperm.xlu2 %729, %v795_v4  }
  0x85   :  { %v93_v42 = vpop.permute.xlu1 %92  ;;  %179 = vperm.xlu0 %731, %v44_v40   ;;  %346 = vperm.xlu1 %728, %v910_v28   ;;  %v959_v43 = vpop.permute.xlu0 %285 }
  0x86   :  { %v143_v53 = vmul.f32 %v967_v45, %v93_v42 }
  0x8c   :  { %v175_v48 = vpop.permute.xlu2 %174  ;;  %362 = vperm.xlu2 %729, %v785_v2  }
  0x8d   :  { %v974_v49 = vadd.f32 %v175_v48, %v140_v47  ;;  %v108_v50 = vpop.permute.xlu1 %107  ;;  %194 = vperm.xlu0 %731, %v47_v46   ;;  %358 = vperm.xlu1 %728, %v809_v6   ;;  %v977_v51 = vpop.permute.xlu0 %297 }
  0x8e   :  { %v146_v59 = vmul.f32 %v967_v45, %v108_v50 }
  0x94   :  { %v190_v54 = vpop.permute.xlu2 %189  ;;  %370 = vperm.xlu2 %729, %v814_v7  }
  0x95   :  { %v984_v55 = vadd.f32 %v190_v54, %v143_v53  ;;  %v123_v56 = vpop.permute.xlu1 %122  ;;  %209 = vperm.xlu0 %731, %v50_v52   ;;  %366 = vperm.xlu1 %728, %v804_v5   ;;  %v987_v57 = vpop.permute.xlu0 %309 }
  0x96   :  { %v149_v17 = vmul.f32 %v967_v45, %v123_v56 }
  0x9c   :  { %v205_v60 = vpop.permute.xlu2 %204  ;;  %382 = vperm.xlu2 %729, %v832_v10  }
  0x9d   :  { %v994_v61 = vadd.f32 %v205_v60, %v146_v59  ;;  %v155_v62 = vpop.permute.xlu1 %154  ;;  %224 = vperm.xlu0 %731, %v53_v58   ;;  %378 = vperm.xlu1 %728, %v822_v8  }
  0x9e   :  { %v997_v63 = vpop.permute.xlu0 %354 }
  0xa4   :  { %v220_v19 = vpop.permute.xlu2 %219  ;;  %394 = vperm.xlu2 %729, %v850_v13  }
  0xa5   :  { %v1005_v20 = vadd.f32 %v220_v19, %v149_v17  ;;  %v170_v21 = vpop.permute.xlu1 %169  ;;  %573 = vperm.xlu0 %731, %v555_v0   ;;  %390 = vperm.xlu1 %728, %v840_v11  }
  0xa6   :  { %v235_v22 = vadd.f32 %v170_v21, %v139_v18  ;;  %v1008_v23 = vpop.permute.xlu0 %374 }
  0xac   :  { %406 = vperm.xlu2 %729, %v868_v16  }
  0xad   :  { %v185_v25 = vpop.permute.xlu1 %184  ;;  %598 = vperm.xlu0 %731, %v560_v24   ;;  %402 = vperm.xlu1 %728, %v858_v14   ;;  %v250_v26 = vpop.permute.xlu2 %249 }
  0xae   :  { %v1015_v27 = vpop.permute.xlu0 %386 }
  0xb4   :  { %733 = vset.pattern.permute.xlu2 %v749_v36 }
  0xb5   :  { %v200_v38 = vpop.permute.xlu1 %199  ;;  %613 = vperm.xlu0 %731, %v563_v29   ;;  %732 = vset.pattern.permute.xlu1 %v749_v36  ;;  %v262_v40 = vpop.permute.xlu2 %261 }
  0xb6   :  { %447 = vperm.xlu1 %732, %v795_v4   ;;  %451 = vperm.xlu2 %733, %v790_v3   ;;  %v316_v42 = vmul.f32 %v1021_v30, %v262_v40  ;;  %v1028_v46 = vpop.permute.xlu0 %398  ;;  %v313_v3 = vmul.f32 %v1021_v30, %v250_v26 }
  0xb8   :  { %v1030_v47 = vadd.f32 %v316_v42, %v235_v22  ;;  %v556_v22 = vld [vmem:[%s1265_s3 + $0x8] sm:$0xff]  ;;  %v325_v42 = vmul.f32 %v1021_v30, %v977_v51 }
  0xbd   :  { %v215_v48 = vpop.permute.xlu1 %214  ;;  %736 = vset.pattern.permute.xlu0 %v749_v36  ;;  %v1033_v50 = vpop.permute.xlu2 %269 }
  0xbe   :  { %443 = vperm.xlu0 %736, %v910_v28   ;;  %455 = vperm.xlu1 %732, %v809_v6   ;;  %v314_v28 = vmul.f32 %v1021_v30, %v941_v35 }
  0xbf   :  { %459 = vperm.xlu2 %733, %v785_v2   ;;  %v58_v4 = vpop.permute.xlu0 %57 }
  0xc0   :  { %v136_v52 = vmul.f32 %v967_v45, %v58_v4 }
  0xc2   :  { %v232_v53 = vadd.f32 %v155_v62, %v136_v52  ;;  %v569_v52 = vld [vmem:[%s1265_s3 + $0x70] sm:$0xff] }
  0xc4   :  { %v1040_v54 = vadd.f32 %v313_v3, %v232_v53  ;;  %v558_v53 = vld [vmem:[%s1265_s3 + $0x18] sm:$0xff] }
  0xc5   :  { %v1042_v56 = vpop.permute.xlu1 %229  ;;  %v1044_v58 = vpop.permute.xlu2 %281 }
  0xc6   :  { %463 = vperm.xlu0 %736, %v804_v5   ;;  %467 = vperm.xlu1 %732, %v814_v7  }
  0xc7   :  { %471 = vperm.xlu2 %733, %v827_v9   ;;  %v63_v6 = vpop.permute.xlu0 %62  ;;  %v319_v9 = vmul.f32 %v1021_v30, %v950_v39  ;;  %v322_v39 = vmul.f32 %v1021_v30, %v959_v43 }
  0xc8   :  { %v137_v2 = vmul.f32 %v967_v45, %v63_v6 }
  0xca   :  { %v233_v59 = vadd.f32 %v955_v41, %v137_v2 }
  0xcc   :  { %v330_v60 = vadd.f32 %v314_v28, %v233_v59 }
  0xcd   :  { %v1053_v62 = vpop.permute.xlu2 %293 }
  0xce   :  { %v1055_v0 = vpop.permute.xlu1 %257  ;;  %475 = vperm.xlu0 %736, %v822_v8   ;;  %479 = vperm.xlu1 %732, %v832_v10  }
  0xcf   :  { %483 = vperm.xlu2 %733, %v845_v12   ;;  %v88_v5 = vpop.permute.xlu0 %87 }
  0xd0   :  { %v142_v7 = vmul.f32 %v967_v45, %v88_v5 }
  0xd2   :  { %v238_v35 = vadd.f32 %v185_v25, %v142_v7 }
  0xd4   :  { %v1063_v17 = vadd.f32 %v319_v9, %v238_v35  ;;  %v328_v9 = vmul.f32 %v1021_v30, %v987_v57 }
  0xd5   :  { %v1065_v41 = vpop.permute.xlu2 %305 }
  0xd6   :  { %v266_v18 = vpop.permute.xlu1 %265  ;;  %487 = vperm.xlu0 %736, %v840_v11   ;;  %491 = vperm.xlu1 %732, %v850_v13   ;;  %v1081_v13 = vperm.slane %v964_v44, 2 }
  0xd7   :  { %v317_v8 = vmul.f32 %v1021_v30, %v266_v18  ;;  %495 = vperm.xlu2 %733, %v863_v15   ;;  %v103_v10 = vpop.permute.xlu0 %102  ;;  %v557_v15 = vld [vmem:[%s1265_s3 + $0x10] sm:$0xff] }
  0xd8   :  { %v145_v12 = vmul.f32 %v967_v45, %v103_v10 }
  0xd9   :  { %v333_v19 = vadd.f32 %v317_v8, %v974_v49  ;;  %v561_v8 = vld [vmem:[%s1265_s3 + $0x30] sm:$0xff] }
  0xda   :  { %v241_v21 = vadd.f32 %v200_v38, %v145_v12  ;;  %v417_v38 = vmul.f32 %v1081_v13, %v1008_v23 }
  0xdc   :  { %v1078_v11 = vadd.f32 %v322_v39, %v241_v21  ;;  %v315_v21 = vmul.f32 %v1021_v30, %v1055_v0  ;;  %v564_v0 = vld [vmem:[%s1265_s3 + $0x48] sm:$0xff] }
  0xde   :  { %v278_v24 = vpop.permute.xlu1 %277  ;;  %499 = vperm.xlu0 %736, %v858_v14   ;;  %734 = vset.pattern.permute.xlu1 %v747_v1  ;;  %v351_v43 = vpop.permute.xlu2 %350 }
  0xdf   :  { %v320_v49 = vmul.f32 %v1021_v30, %v278_v24  ;;  %735 = vset.pattern.permute.xlu2 %v747_v1  ;;  %v118_v25 = vpop.permute.xlu0 %117  ;;  %578 = vperm.xlu1 %734, %v556_v22   ;;  %v411_v26 = vmul.f32 %v1081_v13, %v351_v43  ;;  %v412_v43 = vmul.f32 %v1081_v13, %v997_v63 }
  0xe0   :  { %v148_v29 = vmul.f32 %v967_v45, %v118_v25  ;;  %583 = vperm.xlu2 %735, %v557_v15   ;;  %v423_v15 = vmul.f32 %v1081_v13, %v1028_v46  ;;  %v565_v46 = vld [vmem:[%s1265_s3 + $0x50] sm:$0xff] }
  0xe1   :  { %v336_v40 = vadd.f32 %v320_v49, %v984_v55  ;;  %v1095_v14 = vadd.f32 %v411_v26, %v330_v60  ;;  %v559_v55 = vld [vmem:[%s1265_s3 + $0x20] sm:$0xff]  ;;  %v420_v60 = vmul.f32 %v1081_v13, %v1015_v27  ;;  %v562_v27 = vld [vmem:[%s1265_s3 + $0x38] sm:$0xff] }
  0xe2   :  { %v244_v4 = vadd.f32 %v215_v48, %v148_v29 }
  0xe3   :  { %v1099_v3 = vadd.f32 %v417_v38, %v336_v40  ;;  %v318_v40 = vmul.f32 %v1021_v30, %v1033_v50  ;;  %v144_v50 = vmul.f32 %v967_v45, %v931_v32 }
  0xe4   :  { %v1107_v6 = vadd.f32 %v325_v42, %v244_v4 }
  0xe6   :  { %v290_v23 = vpop.permute.xlu1 %289  ;;  %739 = vset.pattern.permute.xlu0 %v747_v1  ;;  %v363_v51 = vpop.permute.xlu2 %362 }
  0xe7   :  { %v323_v48 = vmul.f32 %v1021_v30, %v290_v23  ;;  %643 = vperm.xlu0 %739, %v569_v52   ;;  %v133_v2 = vpop.permute.xlu0 %132  ;;  %588 = vperm.xlu1 %734, %v558_v53   ;;  %v414_v28 = vmul.f32 %v1081_v13, %v363_v51  ;;  %v566_v23 = vld [vmem:[%s1265_s3 + $0x58] sm:$0xff] }
  0xe8   :  { %v151_v59 = vmul.f32 %v967_v45, %v133_v2  ;;  %593 = vperm.xlu2 %735, %v559_v55  }
  0xe9   :  { %v339_v5 = vadd.f32 %v323_v48, %v994_v61  ;;  %v1119_v7 = vadd.f32 %v414_v28, %v333_v19  ;;  %v138_v61 = vmul.f32 %v967_v45, %v938_v34 }
  0xea   :  { %v247_v35 = vadd.f32 %v1042_v56, %v151_v59 }
  0xeb   :  { %v1124_v18 = vadd.f32 %v420_v60, %v339_v5 }
  0xec   :  { %v1129_v10 = vadd.f32 %v328_v9, %v247_v35  ;;  %v567_v9 = vld [vmem:[%s1265_s3 + $0x60] sm:$0xff] }
  0xee   :  { %v302_v12 = vpop.permute.xlu1 %301  ;;  %v371_v19 = vpop.permute.xlu2 %370 }
  0xef   :  { %v326_v57 = vmul.f32 %v1021_v30, %v302_v12  ;;  %v165_v56 = vpop.permute.xlu0 %164  ;;  %603 = vperm.xlu1 %734, %v561_v8   ;;  %v416_v39 = vmul.f32 %v1081_v13, %v371_v19 }
  0xf0   :  { %v234_v22 = vadd.f32 %v165_v56, %v138_v61  ;;  %608 = vperm.xlu2 %735, %v562_v27   ;;  %v150_v56 = vmul.f32 %v967_v45, %v948_v37 }
  0xf1   :  { %v342_v24 = vadd.f32 %v326_v57, %v1005_v20  ;;  %v1144_v34 = vadd.f32 %v416_v39, %v1063_v17  ;;  %v141_v20 = vmul.f32 %v967_v45, %v926_v31  ;;  %v10_v31 = vstv %s1266_s4  ;;  %v570_v57 = vld [vmem:[%s1265_s3 + $0x78] sm:$0xff] }
  0xf2   :  { %v331_v49 = vadd.f32 %v315_v21, %v234_v22  ;;  %11 = vst [vmem:[#allocation2] sm:$0x1] %v10_v31 }
  0xf3   :  { %v1148_v25 = vadd.f32 %v423_v15, %v342_v24 }
  0xf4   :  { %v1153_v26 = vadd.f32 %v412_v43, %v331_v49 }
  0xf6   :  { %v383_v17 = vpop.permute.xlu2 %382 }
  0xf7   :  { %v180_v29 = vpop.permute.xlu0 %179  ;;  %618 = vperm.xlu1 %734, %v564_v0   ;;  %v347_v63 = vpop.permute.xlu1 %346  ;;  %v419_v38 = vmul.f32 %v1081_v13, %v383_v17 }
  0xf8   :  { %v237_v42 = vadd.f32 %v180_v29, %v141_v20  ;;  %v410_v4 = vmul.f32 %v1081_v13, %v347_v63  ;;  %623 = vperm.xlu2 %735, %v565_v46  }
  0xf9   :  { %v1165_v52 = vadd.f32 %v419_v38, %v1078_v11  ;;  %v688_v21 = vld [vmem:[#allocation2] sm:$0x1] }
  0xfa   :  { %v334_v53 = vadd.f32 %v318_v40, %v237_v42  ;;  %v1168_v55 = vadd.f32 %v410_v4, %v1040_v54  ;;  %v321_v54 = vmul.f32 %v1021_v30, %v1044_v58  ;;  %v147_v58 = vmul.f32 %v967_v45, %v936_v33 }
  0xfe   :  { %v395_v51 = vpop.permute.xlu2 %394 }
  0xff   :  { %v195_v48 = vpop.permute.xlu0 %194  ;;  %628 = vperm.xlu1 %734, %v566_v23   ;;  %v359_v11 = vpop.permute.xlu1 %358  ;;  %v422_v2 = vmul.f32 %v1081_v13, %v395_v51 }
 0x100   :  { %v240_v28 = vadd.f32 %v195_v48, %v144_v50  ;;  %v413_v59 = vmul.f32 %v1081_v13, %v359_v11  ;;  %737 = vset.pattern.permute.xlu2 %v749_v36  ;;  %v1223_v50 = vperm.slane %v964_v44, 3 }
 0x101   :  { %v1184_v60 = vadd.f32 %v422_v2, %v1107_v6  ;;  %503 = vperm.xlu2 %737, %v868_v16   ;;  %v568_v16 = vld [vmem:[%s1265_s3 + $0x68] sm:$0xff] }
 0x102   :  { %v337_v32 = vadd.f32 %v321_v54, %v240_v28  ;;  %v1188_v5 = vadd.f32 %v413_v59, %v1030_v47  ;;  %v324_v47 = vmul.f32 %v1021_v30, %v1053_v62 }
 0x106   :  { %v407_v35 = vpop.permute.xlu2 %406 }
 0x107   :  { %v210_v8 = vpop.permute.xlu0 %209  ;;  %633 = vperm.xlu1 %734, %v567_v9   ;;  %v367_v36 = vpop.permute.xlu1 %366  ;;  %v425_v6 = vmul.f32 %v1081_v13, %v407_v35 }
 0x108   :  { %v243_v27 = vadd.f32 %v210_v8, %v147_v58  ;;  %v415_v61 = vmul.f32 %v1081_v13, %v367_v36 }
 0x109   :  { %v1203_v12 = vadd.f32 %v425_v6, %v1129_v10  ;;  %738 = vset.pattern.permute.xlu2 %v747_v1  ;;  %v327_v10 = vmul.f32 %v1021_v30, %v1065_v41 }
 0x10a   :  { %v340_v33 = vadd.f32 %v324_v47, %v243_v27  ;;  %v431_v19 = vadd.f32 %v415_v61, %v334_v53  ;;  %638 = vperm.xlu2 %738, %v568_v16  }
 0x10f   :  { %v225_v39 = vpop.permute.xlu0 %224  ;;  %648 = vperm.xlu1 %734, %v570_v57   ;;  %v379_v62 = vpop.permute.xlu1 %378 }
 0x110   :  { %v246_v22 = vadd.f32 %v225_v39, %v150_v56  ;;  %v418_v1 = vmul.f32 %v1081_v13, %v379_v62  ;;  %v452_v43 = vpop.permute.xlu2 %451 }
 0x111   :  { %v509_v2 = vmul.f32 %v1223_v50, %v452_v43 }
 0x112   :  { %v343_v15 = vadd.f32 %v327_v10, %v246_v22  ;;  %v434_v24 = vadd.f32 %v418_v1, %v337_v32  ;;  %691 = vperm.xlu2 %738, %v688_v21  }
 0x113   :  { %v525_v32 = vadd.f32 %v509_v2, %v1153_v26 }
 0x115   :  { %v541_v16 = vmax.f32 %v525_v32, 0.0 }
 0x117   :  { %v391_v49 = vpop.permute.xlu1 %390  ;;  %v574_v29 = vpop.permute.xlu0 %573 }
 0x118   :  { %v421_v0 = vmul.f32 %v1081_v13, %v391_v49 }
 0x119   :  { %v460_v37 = vpop.permute.xlu2 %459 }
 0x11a   :  { %v1215_v46 = vadd.f32 %v421_v0, %v340_v33  ;;  %v511_v35 = vmul.f32 %v1223_v50, %v460_v37 }
 0x11c   :  { %v527_v33 = vadd.f32 %v511_v35, %v1119_v7 }
 0x11e   :  { %v543_v21 = vmax.f32 %v527_v33, 0.0 }
 0x11f   :  { %v403_v45 = vpop.permute.xlu1 %402  ;;  %v599_v63 = vpop.permute.xlu0 %598 }
 0x120   :  { %v424_v20 = vmul.f32 %v1081_v13, %v403_v45 }
 0x121   :  { %v472_v41 = vpop.permute.xlu2 %471 }
 0x122   :  { %v1218_v17 = vadd.f32 %v424_v20, %v343_v15  ;;  %v514_v22 = vmul.f32 %v1223_v50, %v472_v41 }
 0x124   :  { %v530_v7 = vadd.f32 %v514_v22, %v1099_v3 }
 0x127   :  { %v614_v4 = vpop.permute.xlu0 %613 }
 0x128   :  { %v448_v30 = vpop.permute.xlu1 %447 }
 0x129   :  { %v484_v40 = vpop.permute.xlu2 %483  ;;  %v508_v48 = vmul.f32 %v1223_v50, %v448_v30 }
 0x12a   :  { %v517_v41 = vmul.f32 %v1223_v50, %v484_v40 }
 0x12b   :  { %v524_v28 = vadd.f32 %v508_v48, %v1095_v14 }
 0x12c   :  { %v533_v3 = vadd.f32 %v517_v41, %v1124_v18 }
 0x12d   :  { %v540_v58 = vmax.f32 %v524_v28, 0.0 }
 0x130   :  { %v456_v38 = vpop.permute.xlu1 %455  ;;  %v444_v23 = vpop.permute.xlu0 %443 }
 0x131   :  { %v1220_v53 = vpop.permute.xlu2 %495  ;;  %v507_v51 = vmul.f32 %v1223_v50, %v444_v23  ;;  %v510_v44 = vmul.f32 %v1223_v50, %v456_v38 }
 0x133   :  { %v523_v54 = vadd.f32 %v507_v51, %v1168_v55  ;;  %v526_v55 = vadd.f32 %v510_v44, %v1188_v5  ;;  %v546_v51 = vmax.f32 %v530_v7, 0.0  ;;  %v549_v44 = vmax.f32 %v533_v3, 0.0 }
 0x135   :  { %v539_v9 = vmax.f32 %v523_v54, 0.0  ;;  %v542_v62 = vmax.f32 %v526_v55, 0.0 }
 0x137   :  { %v651_v47 = vmul.f32 %v574_v29, %v539_v9 }
 0x138   :  { %v468_v42 = vpop.permute.xlu1 %467  ;;  %v464_v59 = vpop.permute.xlu0 %463 }
 0x139   :  { %v512_v6 = vmul.f32 %v1223_v50, %v464_v59  ;;  %v513_v39 = vmul.f32 %v1223_v50, %v468_v42 }
 0x13a   :  { %v584_v13 = vpop.permute.xlu2 %583 }
 0x13b   :  { %v653_v61 = vmul.f32 %v584_v13, %v541_v16  ;;  %v528_v26 = vadd.f32 %v512_v6, %v431_v19  ;;  %v529_v5 = vadd.f32 %v513_v39, %v1144_v34 }
 0x13d   :  { %v544_v1 = vmax.f32 %v528_v26, 0.0  ;;  %v545_v30 = vmax.f32 %v529_v5, 0.0 }
 0x13f   :  { %v656_v19 = vmul.f32 %v599_v63, %v544_v1 }
 0x140   :  { %v480_v31 = vpop.permute.xlu1 %479  ;;  %v476_v56 = vpop.permute.xlu0 %475 }
 0x141   :  { %v515_v15 = vmul.f32 %v1223_v50, %v476_v56  ;;  %v516_v29 = vmul.f32 %v1223_v50, %v480_v31 }
 0x142   :  { %v594_v8 = vpop.permute.xlu2 %593 }
 0x143   :  { %v655_v0 = vmul.f32 %v594_v8, %v543_v21  ;;  %v531_v45 = vadd.f32 %v515_v15, %v434_v24  ;;  %v532_v48 = vadd.f32 %v516_v29, %v1165_v52 }
 0x145   :  { %v547_v23 = vmax.f32 %v531_v45, 0.0  ;;  %v548_v59 = vmax.f32 %v532_v48, 0.0 }
 0x147   :  { %v659_v24 = vmul.f32 %v614_v4, %v547_v23 }
 0x148   :  { %v1227_v11 = vpop.permute.xlu1 %491  ;;  %v488_v54 = vpop.permute.xlu0 %487 }
 0x149   :  { %v518_v31 = vmul.f32 %v1223_v50, %v488_v54  ;;  %v519_v6 = vmul.f32 %v1223_v50, %v1227_v11 }
 0x14a   :  { %v609_v49 = vpop.permute.xlu2 %608 }
 0x14b   :  { %v658_v34 = vmul.f32 %v609_v49, %v546_v51  ;;  %v535_v55 = vadd.f32 %v519_v6, %v1184_v60 }
 0x150   :  { %v500_v18 = vpop.permute.xlu0 %499 }
 0x151   :  { %v579_v36 = vpop.permute.xlu1 %578 }
 0x152   :  { %v652_v27 = vmul.f32 %v579_v36, %v540_v58  ;;  %v624_v28 = vpop.permute.xlu2 %623  ;;  %v534_v58 = vadd.f32 %v518_v31, %v1215_v46 }
 0x153   :  { %v661_v35 = vmul.f32 %v624_v28, %v549_v44 }
 0x154   :  { %v667_v14 = vadd.f32 %v652_v27, %v651_v47  ;;  %v550_v16 = vmax.f32 %v534_v58, 0.0  ;;  %v520_v47 = vmul.f32 %v1223_v50, %v1220_v53 }
 0x156   :  { %v668_v57 = vadd.f32 %v667_v14, %v653_v61  ;;  %v521_v61 = vmul.f32 %v1223_v50, %v500_v18  ;;  %v536_v46 = vadd.f32 %v520_v47, %v1148_v25 }
 0x158   :  { %v537_v33 = vadd.f32 %v521_v61, %v1218_v17  ;;  %v552_v39 = vmax.f32 %v536_v46, 0.0 }
 0x159   :  { %v589_v10 = vpop.permute.xlu1 %588  ;;  %v644_v21 = vpop.permute.xlu0 %643 }
 0x15a   :  { %v654_v43 = vmul.f32 %v589_v10, %v542_v62  ;;  %v553_v10 = vmax.f32 %v537_v33, 0.0 }
 0x15b   :  { %v504_v36 = vpop.permute.xlu2 %503 }
 0x15c   :  { %v669_v37 = vadd.f32 %v668_v57, %v654_v43  ;;  %v522_v26 = vmul.f32 %v1223_v50, %v504_v36  ;;  %v551_v57 = vmax.f32 %v535_v55, 0.0  ;;  %v665_v1 = vmul.f32 %v644_v21, %v553_v10 }
 0x15e   :  { %v670_v20 = vadd.f32 %v669_v37, %v655_v0  ;;  %v538_v53 = vadd.f32 %v522_v26, %v1203_v12 }
 0x160   :  { %v671_v38 = vadd.f32 %v670_v20, %v656_v19  ;;  %v554_v43 = vmax.f32 %v538_v53, 0.0 }
 0x161   :  { %v604_v42 = vpop.permute.xlu1 %603 }
 0x162   :  { %v657_v13 = vmul.f32 %v604_v42, %v545_v30 }
 0x164   :  { %v672_v2 = vadd.f32 %v671_v38, %v657_v13  ;;  %v639_v11 = vpop.permute.xlu2 %638 }
 0x165   :  { %v664_v22 = vmul.f32 %v639_v11, %v552_v39 }
 0x166   :  { %v673_v63 = vadd.f32 %v672_v2, %v658_v34  ;;  %v710_v34 = vlaneseq }
 0x168   :  { %v674_v32 = vadd.f32 %v673_v63, %v659_v24  ;;  %v711_v28 = vshrl.u32 %v710_v34, 7 }
 0x169   :  { %v619_v9 = vpop.permute.xlu1 %618 }
 0x16a   :  { %v660_v40 = vmul.f32 %v619_v9, %v548_v59  ;;  %vm712_vm0 = vcmp.eq.s32.totalorder %v711_v28, 0 }
 0x16c   :  { %v675_v8 = vadd.f32 %v674_v32, %v660_v40  ;;  %v692_v19 = vpop.permute.xlu2 %691 }
 0x16d   :  { %v694_v20 = vperm.slane %v692_v19, 0 }
 0x16e   :  { %v676_v52 = vadd.f32 %v675_v8, %v661_v35 }
 0x171   :  { %v629_v4 = vpop.permute.xlu1 %628 }
 0x172   :  { %v662_v27 = vmul.f32 %v629_v4, %v550_v16 }
 0x174   :  { %v677_v14 = vadd.f32 %v676_v52, %v662_v27 }
 0x179   :  { %v634_v56 = vpop.permute.xlu1 %633 }
 0x17a   :  { %v663_v62 = vmul.f32 %v634_v56, %v551_v57 }
 0x17c   :  { %v678_v60 = vadd.f32 %v677_v14, %v663_v62 }
 0x17e   :  { %v679_v15 = vadd.f32 %v678_v60, %v664_v22 }
 0x180   :  { %v680_v49 = vadd.f32 %v679_v15, %v665_v1 }
 0x181   :  { %v649_v25 = vpop.permute.xlu1 %648 }
 0x182   :  { %v666_v5 = vmul.f32 %v649_v25, %v554_v43 }
 0x184   :  { %v681_v17 = vadd.f32 %v680_v49, %v666_v5 }
 0x186   :  { %v682_v0 = vrot.slane %v681_v17, 4 }
 0x188   :  { %v683_v50 = vadd.f32 %v682_v0, %v681_v17 }
 0x18a   :  { %v684_v37 = vrot.slane %v683_v50, 2 }
 0x18c   :  { %v685_v7 = vadd.f32 %v684_v37, %v683_v50 }
 0x18e   :  { %v686_v45 = vrot.slane %v685_v7, 1 }
 0x190   :  { %v687_v29 = vadd.f32 %v686_v45, %v685_v7 }
 0x192   :  { %v695_v30 = vadd.f32 %v694_v20, %v687_v29 }
 0x194   :  { %v696_v38 = vmax.f32 %v695_v30, 0.0 }
 0x196   :  { %v697_v12 = vsub.f32 %v695_v30, %v696_v38  ;;  %v700_v42 = vsub.f32 0.0, %v696_v38 }
 0x198   :  { %v698_v41 = vmul.f32 1.442695, %v697_v12  ;;  %v701_v23 = vmul.f32 1.442695, %v700_v42 }
 0x19a   :  { %740 = vpow2.f32 %v698_v41 }
 0x19b   :  { %742 = vpow2.f32 %v701_v23 }
 0x1a0   :  { %v741_v51 = vpop.eup %740 }
 0x1a1   :  { %v743_v13 = vpop.eup %742 }
 0x1a2   :  { %v703_v48 = vadd.f32 %v743_v13, %v741_v51 }
 0x1a4   :  { %744 = vrcp.f32 %v703_v48 }
 0x1aa   :  { %v745_v2 = vpop.eup %744 }
 0x1ab   :  { %v705_v54 = vmul.f32 %v745_v2, %v703_v48 }
 0x1ad   :  { %v706_v3 = vsub.f32 2.0, %v705_v54 }
 0x1af   :  { %v707_v24 = vmul.f32 %v745_v2, %v706_v3 }
 0x1b1   :  { %v708_v63 = vmul.f32 %v741_v51, %v707_v24  ;;  %v709_v31 = vmul.f32 %v743_v13, %v707_v24 }
 0x1b3   :  { %v713_v59 = vsel %vm712_vm0, %v708_v63, %v709_v31 }
 0x1b4   :  { %714 = vst [vmem:[%s1267_s5] sm:$0x3] %v713_v59 }

</bundles_post_ra>
